<compile_context>
chip_gen: v6e
topology: v6e:2x2x1
jax: 0.10.0
libtpu: 0.0.40
codegen_flags: <defaults>
</compile_context>

<pallas_src>
import functools
from typing import Any, NamedTuple

import jax
import jax.numpy as jnp
from jax.experimental import pallas as pl
from jax.experimental.pallas import tpu as pltpu


def _round_up(x, m):
    return (x + m - 1) // m * m


def _xavier_uniform(key, fan_in, fan_out):
    bound = (6.0 / (fan_in + fan_out)) ** 0.5
    # stored as [in, out] (transpose of torch's [out, in]); symmetric init so equivalent.
    return jax.random.uniform(key, (fan_in, fan_out), jnp.float32, -bound, bound)


# --------------------------------------------------------------------------- #
# Kernel
# --------------------------------------------------------------------------- #
def control_unit_kernel(s_valid,                 # static: number of valid context positions
                        step_ref,                # scalar prefetch (consumed by index_maps)
                        q_ref, ctrl_ref, ctx_ref,
                        wpos_ref, bpos_ref,
                        wcqc_ref, wcqp_ref, bcq_ref,
                        wattn_ref, battn_ref,
                        out_ref):
    del step_ref  # only used by the index_maps to select w_pos[step] / b_pos[step]
    f32 = jnp.float32

    # 1) position_aware = question @ W_pos[step] + b_pos[step]              [TB, Dp]
    #    (bf16 MXU operands, f32 accumulation)
    pa = jnp.dot(q_ref[...], wpos_ref[0], preferred_element_type=f32) + bpos_ref[0]

    # 2) control_question = cat([control, position_aware]) @ W_cq + b_cq    [TB, Dp]
    #    split matmul over the two halves of W_cq (avoids an in-kernel concat)
    cq = (jnp.dot(ctrl_ref[...], wcqc_ref[...], preferred_element_type=f32)
          + jnp.dot(pa.astype(wcqp_ref.dtype), wcqp_ref[...], preferred_element_type=f32)
          + bcq_ref[...])

    # 3) attention logits: fold the (dim -> 1) attn linear into cq once (one
    #    [TB, Dp] VPU multiply), then a VPU broadcast-multiply + lane reduce over
    #    D.  (The previous M=1 batched MXU einsum ran at <=1/256 MXU utilization
    #    on v6e/v7x and dominated wall clock; VPU + XLU reduce is faster here.)
    ctx = ctx_ref[...]                                # [TB, Sp, Dp] (ctx dtype)
    cq_s = cq * wattn_ref[...]                        # [TB, Dp] f32
    logits = jnp.sum(cq_s[:, None, :] * ctx, axis=-1)  # f32 [TB, Sp]
    logits = logits + battn_ref[0, 0]                 # scalar bias from SMEM

    # mask padded sequence positions (logits stay f32, so -1e30 is safe)
    sp = logits.shape[-1]
    if s_valid < sp:
        pos = jax.lax.broadcasted_iota(jnp.int32, logits.shape, 1)
        logits = jnp.where(pos < s_valid, logits, -1e30)

    # 4) softmax over the sequence axis (EUP approx reciprocal for the normalize)
    m = jnp.max(logits, axis=-1, keepdims=True)
    e = jnp.exp(logits - m)
    attn = e * pl.reciprocal(jnp.sum(e, axis=-1, keepdims=True), approx=True)

    # 5) next_control = sum_s attn[b, s] * ctx[b, s, :]
    #    VPU lane-broadcast multiply + sublane reduce (again, no M=1 MXU matmul).
    out = jnp.sum(attn[:, :, None] * ctx, axis=1)     # f32 [TB, Dp]
    out_ref[...] = out.astype(out_ref.dtype)


# --------------------------------------------------------------------------- #
# Prepare-once wrapper (pads / casts the step-invariant operands a single time)
# --------------------------------------------------------------------------- #
class PreparedControlUnit(NamedTuple):
    call: Any            # the pallas_call callable (built once)
    q_p: jax.Array
    ctx_p: jax.Array
    w_pos_p: jax.Array
    b_pos_p: jax.Array
    w_cq_c: jax.Array
    w_cq_p: jax.Array
    b_cq_p: jax.Array
    w_attn_p: jax.Array
    b_attn_p: jax.Array
    B: int
    dim: int
    Dp: int
    Bp: int
    compute_dtype: Any


def prepare_control_unit(context, question, params, *,
                         context_dtype=jnp.bfloat16,
                         compute_dtype=jnp.bfloat16,
                         block_b=None):
    """Pad/cast the step-invariant operands once and build the pallas_call.

    ControlUnit is invoked max_step times with the same context / question /
    weights; hoisting the pad+cast here removes a full HBM read+write of the
    dominant (context) operand from every step."""
    B, S, D = context.shape
    w_pos, b_pos, w_cq, b_cq, w_attn, b_attn = params
    max_step = w_pos.shape[0]
    f32 = jnp.float32
    cd = jnp.dtype(compute_dtype)
    ctx_dt = jnp.dtype(context_dtype)

    # sublane granularity: 16 when any sub-32-bit operand sits on a sublane axis
    sub = 16 if (cd.itemsize < 4 or ctx_dt.itemsize < 4) else 8

    # lane-dense feature axes; sequence lane-dense for longer contexts
    Dp = _round_up(D, 128)
    Qp = _round_up(2 * D, 128)
    Sp = _round_up(S, 128) if S >= 64 else _round_up(S, sub)

    # ---- per-generation VMEM budget → batch tile --------------------------- #
    try:
        info = pltpu.get_tpu_info()
        vmem_physical = int(getattr(info, "vmem_capacity_bytes", 64 * 1024 * 1024))
    except Exception:
        vmem_physical = 64 * 1024 * 1024           # conservative fallback
    # ~48 MiB on v7x (64 MiB physical), ~96 MiB on v5e/v6e (128 MiB physical)
    vmem_limit = int(min(vmem_physical * 3 // 4, 96 * 1024 * 1024))

    # resident weight blocks (worst case: double-buffered allocation)
    weight_bytes = 2 * ((Qp * Dp + 2 * Dp * Dp) * cd.itemsize + 3 * Dp * 4)
    # per batch-row VMEM: double-buffered ctx block + f32 upcast / product
    # temporaries for the two VPU contractions + q / ctrl / out blocks
    per_row = (Sp * Dp * (2 * ctx_dt.itemsize + 12)
               + 2 * (Qp + Dp) * cd.itemsize + 2 * Dp * 4)
    budget = max(vmem_limit - weight_bytes - (2 << 20), per_row * sub)
    tb_cap = max(sub, (budget // per_row) // sub * sub)
    # TODO(synk): for very long contexts where even TB=sub overflows the budget,
    # add an inner S grid axis (last, "arbitrary") with flash-style online-softmax
    # accumulators so VMEM decouples from S*D.

    B_sub = _round_up(B, sub)
    # keep >= 2 grid steps when the batch allows (v7x megacore + pipelining)
    half_cap = max(sub, (B_sub // 2) // sub * sub)
    if block_b is None:
        tb = min(B_sub, 128, tb_cap, half_cap)
        TB = sub
        for cand in (8, 16, 32, 64, 128):          # snap down: clean DB granularity
            if cand % sub == 0 and cand <= tb:
                TB = cand
    else:
        TB = max(sub, _round_up(block_b, sub))
    Bp = _round_up(B, TB)
    n_b = Bp // TB

    # ---- pad / cast step-invariant operands (once) -------------------------- #
    q_p = jnp.pad(question.astype(cd), ((0, Bp - B), (0, Qp - 2 * D)))
    ctx_p = jnp.pad(context.astype(ctx_dt), ((0, Bp - B), (0, Sp - S), (0, Dp - D)))

    w_pos_p = jnp.pad(w_pos.astype(cd), ((0, 0), (0, Qp - 2 * D), (0, Dp - D)))
    b_pos_p = jnp.pad(b_pos.astype(f32), ((0, 0), (0, Dp - D))).reshape(max_step, 1, Dp)
    w_cq_c = jnp.pad(w_cq[:D].astype(cd), ((0, Dp - D), (0, Dp - D)))   # control half
    w_cq_p = jnp.pad(w_cq[D:].astype(cd), ((0, Dp - D), (0, Dp - D)))   # pos-aware half
    b_cq_p = jnp.pad(b_cq.astype(f32), (0, Dp - D)).reshape(1, Dp)
    w_attn_p = jnp.pad(w_attn.astype(f32), (0, Dp - D)).reshape(1, Dp)
    b_attn_p = b_attn.astype(f32).reshape(1, 1)

    grid_spec = pltpu.PrefetchScalarGridSpec(
        num_scalar_prefetch=1,
        grid=(n_b,),
        in_specs=[
            pl.BlockSpec((TB, Qp), lambda i, s: (i, 0)),               # question
            pl.BlockSpec((TB, Dp), lambda i, s: (i, 0)),               # control
            pl.BlockSpec((TB, Sp, Dp), lambda i, s: (i, 0, 0)),        # context
            pl.BlockSpec((1, Qp, Dp), lambda i, s: (s[0], 0, 0)),      # w_pos[step]
            pl.BlockSpec((1, 1, Dp), lambda i, s: (s[0], 0, 0)),       # b_pos[step]
            pl.BlockSpec((Dp, Dp), lambda i, s: (0, 0)),               # w_cq (control half)
            pl.BlockSpec((Dp, Dp), lambda i, s: (0, 0)),               # w_cq (pos-aware half)
            pl.BlockSpec((1, Dp), lambda i, s: (0, 0)),                # b_cq
            pl.BlockSpec((1, Dp), lambda i, s: (0, 0)),                # w_attn
            pl.BlockSpec(memory_space=pltpu.MemorySpace.SMEM),         # b_attn (scalar)
        ],
        out_specs=pl.BlockSpec((TB, Dp), lambda i, s: (i, 0)),
    )

    call = pl.pallas_call(
        functools.partial(control_unit_kernel, S),
        out_shape=jax.ShapeDtypeStruct((Bp, Dp), jnp.float32),
        grid_spec=grid_spec,
        compiler_params=pltpu.CompilerParams(
            dimension_semantics=("parallel",),       # batch tiles -> both TCs on v7x
            vmem_limit_bytes=vmem_limit),
    )

    return PreparedControlUnit(call, q_p, ctx_p, w_pos_p, b_pos_p, w_cq_c, w_cq_p,
                               b_cq_p, w_attn_p, b_attn_p, B, D, Dp, Bp, cd)


def control_unit_step(prepared, step, control):
    """Run one ControlUnit step; only the small [B, dim] control is padded here."""
    p = prepared
    c_p = jnp.pad(control.astype(p.compute_dtype),
                  ((0, p.Bp - p.B), (0, p.Dp - p.dim)))
    out = p.call(jnp.array([step], jnp.int32),
                 p.q_p, c_p, p.ctx_p,
                 p.w_pos_p, p.b_pos_p, p.w_cq_c, p.w_cq_p, p.b_cq_p,
                 p.w_attn_p, p.b_attn_p)
    return out[:p.B, :p.dim]


def control_unit_forward(step, context, question, control, params, **kwargs):
    """One-off convenience wrapper (prepare + single step)."""
    prepared = prepare_control_unit(context, question, params, **kwargs)
    return control_unit_step(prepared, step, control)


# --------------------------------------------------------------------------- #
# Parameters & pure-JAX reference
# --------------------------------------------------------------------------- #
def make_params(key, dim, max_step):
    keys = jax.random.split(key, max_step + 2)
    w_pos = jnp.stack([_xavier_uniform(keys[i], 2 * dim, dim)
                       for i in range(max_step)])                     # [max_step, 2D, D]
    b_pos = jnp.zeros((max_step, dim), jnp.float32)
    w_cq = _xavier_uniform(keys[max_step], 2 * dim, dim)              # [2D, D]
    b_cq = jnp.zeros((dim,), jnp.float32)
    w_attn = _xavier_uniform(keys[max_step + 1], dim, 1).reshape(dim)  # [D]
    b_attn = jnp.zeros((1,), jnp.float32)
    return (w_pos, b_pos, w_cq, b_cq, w_attn, b_attn)


def reference_forward(step, context, question, control, params):
    """Pure-JAX reference mirroring the PyTorch forward."""
    w_pos, b_pos, w_cq, b_cq, w_attn, b_attn = params
    pa = question @ w_pos[step] + b_pos[step]                         # [B, D]
    cqi = jnp.concatenate([control, pa], axis=1)                      # [B, 2D]
    cq = cqi @ w_cq + b_cq                                            # [B, D]
    prod = cq[:, None, :] * context                                   # [B, S, D]
    logits = prod @ w_attn[:, None] + b_attn                          # [B, S, 1]
    attn = jax.nn.softmax(logits, axis=1)
    return jnp.sum(attn * context, axis=1)                            # [B, D]


if __name__ == "__main__":
    B, S, dim, max_step = 2, 8, 32, 4

    key = jax.random.PRNGKey(0)
    k_ctx, k_q, k_c, k_p = jax.random.split(key, 4)

    context = jax.random.normal(k_ctx, (B, S, dim), jnp.float32)
    question = jax.random.normal(k_q, (B, 2 * dim), jnp.float32)
    control0 = jax.random.normal(k_c, (B, dim), jnp.float32)
    params = make_params(k_p, dim, max_step)

    # ---- f32 path (tight tolerance; only the approx softmax reciprocal differs)
    prep_f32 = prepare_control_unit(context, question, params,
                                    context_dtype=jnp.float32,
                                    compute_dtype=jnp.float32)
    out_f32 = jax.block_until_ready(control_unit_step(prep_f32, 2, control0))
    ref_f32 = reference_forward(2, context, question, control0, params)
    assert out_f32.shape == (B, dim)
    assert jnp.allclose(out_f32, ref_f32, atol=1e-2, rtol=1e-2), "f32 kernel mismatch"

    # ---- default bf16 path: prepare ONCE, then run every MAC step reusing the
    #      padded context / question / weights (per-step work = pad [B, dim]).
    prep = prepare_control_unit(context, question, params)   # bf16 defaults
    ctrl = control0
    for step in range(max_step):
        out = jax.block_until_ready(control_unit_step(prep, step, ctrl))
        ref = reference_forward(step, context, question, ctrl, params)
        assert out.shape == (B, dim)
        assert jnp.allclose(out, ref, atol=1e-1, rtol=1e-1), f"bf16 mismatch at step {step}"
        ctrl = ref   # feed the exact reference forward so per-step errors don't compound

    print("KERNEL_OK")
</pallas_src>

<mosaic_0001>
module attributes {stable_mosaic.version = 11 : i64} {
  func.func @control_unit_kernel(%arg0: i32, %arg1: memref<1xi32, #tpu.memory_space<smem>>, %arg2: memref<8x128xf32, #tpu.memory_space<vmem>>, %arg3: memref<8x128xf32, #tpu.memory_space<vmem>>, %arg4: memref<8x8x128xf32, #tpu.memory_space<vmem>>, %arg5: memref<1x128x128xf32, #tpu.memory_space<vmem>>, %arg6: memref<1x1x128xf32, #tpu.memory_space<vmem>>, %arg7: memref<128x128xf32, #tpu.memory_space<vmem>>, %arg8: memref<128x128xf32, #tpu.memory_space<vmem>>, %arg9: memref<1x128xf32, #tpu.memory_space<vmem>>, %arg10: memref<1x128xf32, #tpu.memory_space<vmem>>, %arg11: memref<1x1xf32, #tpu.memory_space<smem>>, %arg12: memref<8x128xf32, #tpu.memory_space<vmem>>) attributes {dimension_semantics = [#tpu.dimension_semantics<parallel>], iteration_bounds = array<i64: 1>, scalar_prefetch = 1 : i64, scratch_operands = 0 : i64, tpu.core_type = #tpu.core_type<tc>, window_params = [{transform_indices = @transform_0, window_bounds = array<i64: 8, 128>}, {transform_indices = @transform_1, window_bounds = array<i64: 8, 128>}, {transform_indices = @transform_2, window_bounds = array<i64: 8, 8, 128>}, {transform_indices = @transform_3, window_bounds = array<i64: 1, 128, 128>}, {transform_indices = @transform_4, window_bounds = array<i64: 1, 1, 128>}, {pipeline_mode = #tpu.pipeline_mode<synchronous>, transform_indices = @transform_5, window_bounds = array<i64: 128, 128>}, {pipeline_mode = #tpu.pipeline_mode<synchronous>, transform_indices = @transform_6, window_bounds = array<i64: 128, 128>}, {pipeline_mode = #tpu.pipeline_mode<synchronous>, transform_indices = @transform_7, window_bounds = array<i64: 1, 128>}, {pipeline_mode = #tpu.pipeline_mode<synchronous>, transform_indices = @transform_8, window_bounds = array<i64: 1, 128>}, {transform_indices = @transform_9, window_bounds = array<i64: 1, 1>}, {transform_indices = @transform_10, window_bounds = array<i64: 8, 128>}]} {
    %c0 = arith.constant 0 : index
    %c0_0 = arith.constant 0 : index
    %0 = vector.load %arg2[%c0, %c0_0] : memref<8x128xf32, #tpu.memory_space<vmem>>, vector<8x128xf32>
    %c0_1 = arith.constant 0 : index
    %c0_2 = arith.constant 0 : index
    %c0_3 = arith.constant 0 : index
    %1 = vector.load %arg5[%c0_1, %c0_2, %c0_3] : memref<1x128x128xf32, #tpu.memory_space<vmem>>, vector<1x128x128xf32>
    %2 = vector.shape_cast %1 : vector<1x128x128xf32> to vector<128x128xf32>
    %cst = arith.constant dense<0.000000e+00> : vector<8x128xf32>
    %3 = tpu.matmul %0, %2, %cst {dimension_numbers = #tpu.dot_dimension_numbers<[1], [0], [0], [1], [0, 0, 1, 1], [], []>} : vector<8x128xf32>, vector<128x128xf32>, vector<8x128xf32> -> vector<8x128xf32>
    %c0_4 = arith.constant 0 : index
    %c0_5 = arith.constant 0 : index
    %c0_6 = arith.constant 0 : index
    %4 = vector.load %arg6[%c0_4, %c0_5, %c0_6] : memref<1x1x128xf32, #tpu.memory_space<vmem>>, vector<1x1x128xf32>
    %5 = vector.shape_cast %4 : vector<1x1x128xf32> to vector<1x128xf32>
    %6 = vector.broadcast %5 : vector<1x128xf32> to vector<8x128xf32>
    %7 = arith.addf %3, %6 : vector<8x128xf32>
    %c0_7 = arith.constant 0 : index
    %c0_8 = arith.constant 0 : index
    %8 = vector.load %arg3[%c0_7, %c0_8] : memref<8x128xf32, #tpu.memory_space<vmem>>, vector<8x128xf32>
    %c0_9 = arith.constant 0 : index
    %c0_10 = arith.constant 0 : index
    %9 = vector.load %arg7[%c0_9, %c0_10] : memref<128x128xf32, #tpu.memory_space<vmem>>, vector<128x128xf32>
    %cst_11 = arith.constant dense<0.000000e+00> : vector<8x128xf32>
    %10 = tpu.matmul %8, %9, %cst_11 {dimension_numbers = #tpu.dot_dimension_numbers<[1], [0], [0], [1], [0, 0, 1, 1], [], []>} : vector<8x128xf32>, vector<128x128xf32>, vector<8x128xf32> -> vector<8x128xf32>
    %c0_12 = arith.constant 0 : index
    %c0_13 = arith.constant 0 : index
    %11 = vector.load %arg8[%c0_12, %c0_13] : memref<128x128xf32, #tpu.memory_space<vmem>>, vector<128x128xf32>
    %cst_14 = arith.constant dense<0.000000e+00> : vector<8x128xf32>
    %12 = tpu.matmul %7, %11, %cst_14 {dimension_numbers = #tpu.dot_dimension_numbers<[1], [0], [0], [1], [0, 0, 1, 1], [], []>} : vector<8x128xf32>, vector<128x128xf32>, vector<8x128xf32> -> vector<8x128xf32>
    %13 = arith.addf %10, %12 : vector<8x128xf32>
    %c0_15 = arith.constant 0 : index
    %c0_16 = arith.constant 0 : index
    %14 = vector.load %arg9[%c0_15, %c0_16] : memref<1x128xf32, #tpu.memory_space<vmem>>, vector<1x128xf32>
    %15 = vector.broadcast %14 : vector<1x128xf32> to vector<8x128xf32>
    %16 = arith.addf %13, %15 : vector<8x128xf32>
    %c0_17 = arith.constant 0 : index
    %c0_18 = arith.constant 0 : index
    %c0_19 = arith.constant 0 : index
    %17 = vector.load %arg4[%c0_17, %c0_18, %c0_19] : memref<8x8x128xf32, #tpu.memory_space<vmem>>, vector<8x8x128xf32>
    %c0_20 = arith.constant 0 : index
    %c0_21 = arith.constant 0 : index
    %18 = vector.load %arg10[%c0_20, %c0_21] : memref<1x128xf32, #tpu.memory_space<vmem>>, vector<1x128xf32>
    %19 = vector.broadcast %18 : vector<1x128xf32> to vector<8x128xf32>
    %20 = arith.mulf %16, %19 : vector<8x128xf32>
    %21 = vector.shape_cast %20 : vector<8x128xf32> to vector<8x1x128xf32>
    %22 = vector.broadcast %21 : vector<8x1x128xf32> to vector<8x8x128xf32>
    %23 = arith.mulf %22, %17 : vector<8x8x128xf32>
    %cst_22 = arith.constant dense<0.000000e+00> : vector<8x8xf32>
    %24 = vector.multi_reduction <add>, %23, %cst_22 [2] : vector<8x8x128xf32> to vector<8x8xf32>
    %c0_23 = arith.constant 0 : index
    %c0_24 = arith.constant 0 : index
    %25 = memref.load %arg11[%c0_23, %c0_24] : memref<1x1xf32, #tpu.memory_space<smem>>
    %26 = vector.broadcast %25 : f32 to vector<8x8xf32>
    %27 = arith.addf %24, %26 : vector<8x8xf32>
    %cst_25 = arith.constant dense<0xFF800000> : vector<8xf32>
    %28 = vector.multi_reduction <maximumf>, %27, %cst_25 [1] : vector<8x8xf32> to vector<8xf32>
    %29 = vector.shape_cast %28 : vector<8xf32> to vector<8x1xf32>
    %30 = vector.broadcast %29 : vector<8x1xf32> to vector<8x8xf32>
    %31 = arith.subf %27, %30 : vector<8x8xf32>
    %32 = math.exp %31 : vector<8x8xf32>
    %cst_26 = arith.constant dense<0.000000e+00> : vector<8xf32>
    %33 = vector.multi_reduction <add>, %32, %cst_26 [1] : vector<8x8xf32> to vector<8xf32>
    %34 = vector.shape_cast %33 : vector<8xf32> to vector<8x1xf32>
    %35 = tpu.reciprocal %34 {approx = true} : vector<8x1xf32> -> vector<8x1xf32>
    %36 = vector.broadcast %35 : vector<8x1xf32> to vector<8x8xf32>
    %37 = arith.mulf %32, %36 : vector<8x8xf32>
    %38 = vector.shape_cast %37 : vector<8x8xf32> to vector<8x8x1xf32>
    %39 = vector.broadcast %38 : vector<8x8x1xf32> to vector<8x8x128xf32>
    %40 = arith.mulf %39, %17 : vector<8x8x128xf32>
    %cst_27 = arith.constant dense<0.000000e+00> : vector<8x128xf32>
    %41 = vector.multi_reduction <add>, %40, %cst_27 [1] : vector<8x8x128xf32> to vector<8x128xf32>
    %c0_28 = arith.constant 0 : index
    %c0_29 = arith.constant 0 : index
    %42 = vector.load %arg12[%c0_28, %c0_29] : memref<8x128xf32, #tpu.memory_space<vmem>>, vector<8x128xf32>
    tpu.vector_store %arg12[%c0_28, %c0_29], %41 {strides = array<i32>} : memref<8x128xf32, #tpu.memory_space<vmem>>, vector<8x128xf32>,
    return
  }
  func.func @transform_0(%arg0: i32, %arg1: memref<1xi32, #tpu.memory_space<smem>>) -> (i32, i32) {
    %c0_i32 = arith.constant 0 : i32
    %c0_i32_0 = arith.constant 0 : i32
    return %arg0, %c0_i32 : i32, i32
  }
  func.func @transform_1(%arg0: i32, %arg1: memref<1xi32, #tpu.memory_space<smem>>) -> (i32, i32) {
    %c0_i32 = arith.constant 0 : i32
    %c0_i32_0 = arith.constant 0 : i32
    return %arg0, %c0_i32 : i32, i32
  }
  func.func @transform_2(%arg0: i32, %arg1: memref<1xi32, #tpu.memory_space<smem>>) -> (i32, i32, i32) {
    %c0_i32 = arith.constant 0 : i32
    %c0_i32_0 = arith.constant 0 : i32
    %c0_i32_1 = arith.constant 0 : i32
    return %arg0, %c0_i32, %c0_i32_0 : i32, i32, i32
  }
  func.func @transform_3(%arg0: i32, %arg1: memref<1xi32, #tpu.memory_space<smem>>) -> (i32, i32, i32) {
    %c0 = arith.constant 0 : index
    %0 = memref.load %arg1[%c0] : memref<1xi32, #tpu.memory_space<smem>>
    %c0_i32 = arith.constant 0 : i32
    %c0_i32_0 = arith.constant 0 : i32
    %c0_i32_1 = arith.constant 0 : i32
    return %0, %c0_i32, %c0_i32_0 : i32, i32, i32
  }
  func.func @transform_4(%arg0: i32, %arg1: memref<1xi32, #tpu.memory_space<smem>>) -> (i32, i32, i32) {
    %c0 = arith.constant 0 : index
    %0 = memref.load %arg1[%c0] : memref<1xi32, #tpu.memory_space<smem>>
    %c0_i32 = arith.constant 0 : i32
    %c0_i32_0 = arith.constant 0 : i32
    %c0_i32_1 = arith.constant 0 : i32
    return %0, %c0_i32, %c0_i32_0 : i32, i32, i32
  }
  func.func @transform_5(%arg0: i32, %arg1: memref<1xi32, #tpu.memory_space<smem>>) -> (i32, i32) {
    %c0_i32 = arith.constant 0 : i32
    %c0_i32_0 = arith.constant 0 : i32
    %c0_i32_1 = arith.constant 0 : i32
    return %c0_i32, %c0_i32_0 : i32, i32
  }
  func.func @transform_6(%arg0: i32, %arg1: memref<1xi32, #tpu.memory_space<smem>>) -> (i32, i32) {
    %c0_i32 = arith.constant 0 : i32
    %c0_i32_0 = arith.constant 0 : i32
    %c0_i32_1 = arith.constant 0 : i32
    return %c0_i32, %c0_i32_0 : i32, i32
  }
  func.func @transform_7(%arg0: i32, %arg1: memref<1xi32, #tpu.memory_space<smem>>) -> (i32, i32) {
    %c0_i32 = arith.constant 0 : i32
    %c0_i32_0 = arith.constant 0 : i32
    %c0_i32_1 = arith.constant 0 : i32
    return %c0_i32, %c0_i32_0 : i32, i32
  }
  func.func @transform_8(%arg0: i32, %arg1: memref<1xi32, #tpu.memory_space<smem>>) -> (i32, i32) {
    %c0_i32 = arith.constant 0 : i32
    %c0_i32_0 = arith.constant 0 : i32
    %c0_i32_1 = arith.constant 0 : i32
    return %c0_i32, %c0_i32_0 : i32, i32
  }
  func.func @transform_9(%arg0: i32, %arg1: memref<1xi32, #tpu.memory_space<smem>>) -> (i32, i32) {
    %c0_i32 = arith.constant 0 : i32
    %c0_i32_0 = arith.constant 0 : i32
    %c0_i32_1 = arith.constant 0 : i32
    return %c0_i32, %c0_i32_0 : i32, i32
  }
  func.func @transform_10(%arg0: i32, %arg1: memref<1xi32, #tpu.memory_space<smem>>) -> (i32, i32) {
    %c0_i32 = arith.constant 0 : i32
    %c0_i32_0 = arith.constant 0 : i32
    return %arg0, %c0_i32 : i32, i32
  }
}

</mosaic_0001>

<bundles_post_ra>
// kernel: tpu_custom_call.1
= control target key start
LH: loop header
LB: loop body
LE: loop exit
PB: predicated region body
PF: predicated region fallthrough
CT: control target
= control target key end

     0   :  { %18 = vsyncpa [#allocation6], 0  ;;  %s1597_s0 = inlined_call_operand.<no memory space> [shape: s32[1], index: 0, kind: input, shape index: {}]   ;;  %s1598_s1 = inlined_call_operand.hbm [shape: f32[8,128], index: 1, kind: input, shape index: {}]   ;;  %s1599_s2 = inlined_call_operand.hbm [shape: f32[8,128], index: 2, kind: input, shape index: {}]   ;;  %s1600_s3 = inlined_call_operand.hbm [shape: f32[8,8,128], index: 3, kind: input, shape index: {}]   ;;  %s1601_s4 = inlined_call_operand.hbm [shape: f32[4,128,128], index: 4, kind: input, shape index: {}]   ;;  %s1602_s5 = inlined_call_operand.vmem [shape: f32[4,1,128], index: 5, kind: input, shape index: {}]   ;;  %s1603_s6 = inlined_call_operand.hbm [shape: f32[128,128], index: 6, kind: input, shape index: {}]   ;;  %s1604_s7 = inlined_call_operand.hbm [shape: f32[128,128], index: 7, kind: input, shape index: {}]   ;;  %s1605_s8 = inlined_call_operand.vmem [shape: f32[1,128], index: 8, kind: input, shape index: {}]   ;;  %s1606_s9 = inlined_call_operand.vmem [shape: f32[1,128], index: 9, kind: input, shape index: {}]   ;;  %s1607_s10 = inlined_call_operand.<no memory space> [shape: f32[1,1], index: 10, kind: input, shape index: {}]   ;;  %s1608_s11 = inlined_call_operand.hbm [shape: f32[8,128], index: 11, kind: output, shape index: {}]  }
   0x1   :  { %19 = vsyncpa [#allocation9], 0 }
   0x2   :  { %20 = vsyncpa [#allocation12], 0 }
   0x3   :  { %21 = vsyncpa [#allocation15], 0 }
   0x4   :  { %22 = vsyncpa [#allocation7], 0  ;;  %s1285_s17 = smov [#allocation8]   ;;  %s943_s21 = sshll.u32 %s1597_s0, 11 }
   0x5   :  { %s39_s18 = sshll.u32 %s1285_s17, 4  ;;  %s40_s18 = int_to_ptr.vmem [resolvable:$true] %s39_s18 }
   0x6   :  { %s1141_s22 = scalar_lea.vmem %s40_s18, 128  ;;  %p1146_p1 = scmp.lt.s32.totalorder %s40_s18, %s40_s18 }
   0x7   :  { %p1142_p0 = scmp.ne.s32.totalorder %s40_s18, %s1141_s22  ;;  %p1147_p2 = scmp.lt.s32.totalorder %s1141_s22, %s1141_s22 }
   0x9   :  { %p1148_p3 = por %p1147_p2, %p1146_p1 }
   0xb   :  { %p1149_p4 = pnand %p1148_p3, %p1142_p0 }
   0xd   :  { %1152 = shalt.err (!%p1149_p4)
}
   0xe   :  { %42 = dma.hbm_to_vmem [thread:$0]  %s1599_s2, 128, %s40_s18, [#allocation9]  }
   0xf   :  { %s63_s27 = scalar_lea.hbm %s1601_s4, %s943_s21  ;;  %s1286_s28 = smov [#allocation11]  }
  0x10   :  { %s64_s29 = sshll.u32 %s1286_s28, 4  ;;  %s1287_s30 = smov [#allocation5]   ;;  %s65_s29 = int_to_ptr.vmem [resolvable:$true] %s64_s29 }
  0x11   :  { %s29_s12 = sshll.u32 %s1287_s30, 4  ;;  %s1153_s13 = scalar_lea.hbm %s63_s27, 2048  ;;  %s30_s12 = int_to_ptr.vmem [resolvable:$true] %s29_s12 }
  0x12   :  { %p1154_p5 = scmp.ne.s32.totalorder %s63_s27, %s1153_s13  ;;  %s1155_s16 = scalar_lea.hbm %s1601_s4, 8192 }
  0x13   :  { %p1156_p6 = scmp.lt.s32.totalorder %s63_s27, %s1601_s4  ;;  %p1157_p7 = scmp.lt.s32.totalorder %s1155_s16, %s1153_s13 }
  0x15   :  { %p1158_p8 = por %p1157_p7, %p1156_p6 }
  0x17   :  { %p1159_p9 = pnand %p1158_p8, %p1154_p5 }
  0x19   :  { %1162 = shalt.err (!%p1159_p9)
}
  0x1a   :  { %s1163_s2 = scalar_lea.vmem %s65_s29, 2048  ;;  %p1168_p11 = scmp.lt.s32.totalorder %s65_s29, %s65_s29 }
  0x1b   :  { %p1164_p10 = scmp.ne.s32.totalorder %s65_s29, %s1163_s2  ;;  %p1169_p12 = scmp.lt.s32.totalorder %s1163_s2, %s1163_s2 }
  0x1d   :  { %p1170_p13 = por %p1169_p12, %p1168_p11 }
  0x1f   :  { %p1171_p0 = pnand %p1170_p13, %p1164_p10 }
  0x21   :  { %1174 = shalt.err (!%p1171_p0)
}
  0x22   :  { %s1288_s18 = smov 128   ;;  %s1289_s20 = smov 8  }
  0x23   :  { %70 = dma.hbm_to_vmem [thread:$0]  %s63_s27, 2048, %s65_s29, [#allocation12], %s1288_s18, %s1288_s18, %s1289_s20  }
  0x24   :  { %s1183_s21 = scalar_lea.vmem %s30_s12, 128  ;;  %p1188_p2 = scmp.lt.s32.totalorder %s30_s12, %s30_s12 }
  0x25   :  { %p1184_p1 = scmp.ne.s32.totalorder %s30_s12, %s1183_s21  ;;  %p1189_p3 = scmp.lt.s32.totalorder %s1183_s21, %s1183_s21 }
  0x27   :  { %p1190_p4 = por %p1189_p3, %p1188_p2 }
  0x29   :  { %p1191_p5 = pnand %p1190_p4, %p1184_p1 }
  0x2b   :  { %1194 = shalt.err (!%p1191_p5)
}
  0x2c   :  { %32 = dma.hbm_to_vmem [thread:$0]  %s1598_s1, 128, %s30_s12, [#allocation6]  }
  0x2d   :  { %s1290_s23 = smov [#allocation10]   ;;  %s1291_s25 = smov [#allocation13]  }
  0x2e   :  { %s48_s24 = sshll.u32 %s1290_s23, 4  ;;  %s83_s26 = sshll.u32 %s1291_s25, 4  ;;  %s49_s24 = int_to_ptr.vmem [resolvable:$true] %s48_s24  ;;  %s84_s26 = int_to_ptr.vmem [resolvable:$true] %s83_s26 }
  0x2f   :  { %s1203_s28 = scalar_lea.vmem %s49_s24, 1024  ;;  %p1208_p7 = scmp.lt.s32.totalorder %s49_s24, %s49_s24 }
  0x30   :  { %p1204_p6 = scmp.ne.s32.totalorder %s49_s24, %s1203_s28  ;;  %p1209_p8 = scmp.lt.s32.totalorder %s1203_s28, %s1203_s28 }
  0x32   :  { %p1210_p9 = por %p1209_p8, %p1208_p7 }
  0x34   :  { %p1211_p10 = pnand %p1210_p9, %p1204_p6 }
  0x36   :  { %1214 = shalt.err (!%p1211_p10)
}
  0x37   :  { %54 = dma.hbm_to_vmem [thread:$0]  %s1600_s3, 1024, %s49_s24, [#allocation9], %s1288_s18, %s1288_s18, %s1289_s20  }
  0x38   :  { %s1223_s1 = scalar_lea.vmem %s84_s26, 2048  ;;  %p1228_p12 = scmp.lt.s32.totalorder %s84_s26, %s84_s26 }
  0x39   :  { %p1224_p11 = scmp.ne.s32.totalorder %s84_s26, %s1223_s1  ;;  %p1229_p13 = scmp.lt.s32.totalorder %s1223_s1, %s1223_s1 }
  0x3b   :  { %p1230_p0 = por %p1229_p13, %p1228_p12 }
  0x3d   :  { %p1231_p1 = pnand %p1230_p0, %p1224_p11 }
  0x3f   :  { %1234 = shalt.err (!%p1231_p1)
}
  0x40   :  { %89 = dma.hbm_to_vmem [thread:$0]  %s1603_s6, 2048, %s84_s26, [#allocation12], %s1288_s18, %s1288_s18, %s1289_s20  }
  0x41   :  { %s1292_s13 = smov [#allocation14]  }
  0x42   :  { %s95_s14 = sshll.u32 %s1292_s13, 4  ;;  %s96_s14 = int_to_ptr.vmem [resolvable:$true] %s95_s14 }
  0x43   :  { %s1243_s15 = scalar_lea.vmem %s96_s14, 2048  ;;  %p1248_p3 = scmp.lt.s32.totalorder %s96_s14, %s96_s14 }
  0x44   :  { %p1244_p2 = scmp.ne.s32.totalorder %s96_s14, %s1243_s15  ;;  %p1249_p4 = scmp.lt.s32.totalorder %s1243_s15, %s1243_s15 }
  0x46   :  { %p1250_p5 = por %p1249_p4, %p1248_p3 }
  0x48   :  { %p1251_p6 = pnand %p1250_p5, %p1244_p2 }
  0x4a   :  { %1254 = shalt.err (!%p1251_p6)
}
  0x4b   :  { %101 = dma.hbm_to_vmem [thread:$0]  %s1604_s7, 2048, %s96_s14, [#allocation15], %s1288_s18, %s1288_s18, %s1289_s20  }
  0x4c   :  { %1275 = dma.done.wait [#allocation6], 128  }
  0x4d   :  { %1276 = vsyncadd [#allocation6], 4294967168 }
  0x4e   :  { %1277 = dma.done.wait [#allocation9], 1152  }
  0x4f   :  { %1278 = vsyncadd [#allocation9], 4294966144 }
  0x50   :  { %1279 = dma.done.wait [#allocation12], 4096  }
  0x51   :  { %1280 = vsyncadd [#allocation12], 4294963200 }
  0x52   :  { %1281 = dma.done.wait [#allocation15], 2048  }
  0x53   :  { %1282 = vsyncadd [#allocation15], 4294965248  ;;  %v1293_v0 = vmov 0.0   ;;  %vm1294_vm0 = vmmov 0   ;;  %v152_v1 = vld [vmem:[#allocation11 + $0x78] sm:$0xff]  ;;  %v151_v2 = vld [vmem:[#allocation11 + $0x70] sm:$0xff]  ;;  %v432_v59 = vlaneseq }
  0x54   :  { %995 = vmatprep.subr.mxu0 %v1293_v0  ;;  %1027 = vmatprep.mubr.msk.f32.mxu0 %vm1294_vm0, %v1293_v0  ;;  %v150_v3 = vld [vmem:[#allocation11 + $0x68] sm:$0xff]  ;;  %v149_v4 = vld [vmem:[#allocation11 + $0x60] sm:$0xff]  ;;  %v148_v5 = vld [vmem:[#allocation11 + $0x58] sm:$0xff]  ;;  %p132_p7 = scmp.lt.s32.totalorder %s1597_s0, 3  ;;  %v1295_v57 = vmov 1966171168  }
  0x55   :  { %1030 = vmatprep.subr.mxu1 %v1293_v0  ;;  %1062 = vmatprep.mubr.msk.f32.mxu1 %vm1294_vm0, %v1293_v0  ;;  %v262_v6 = vld [vmem:[#allocation14 + $0x78] sm:$0xff]  ;;  %v261_v7 = vld [vmem:[#allocation14 + $0x70] sm:$0xff]  ;;  %v260_v9 = vld [vmem:[#allocation14 + $0x68] sm:$0xff]  ;;  %v430_v58 = vunpack.c.l.s4 %v1295_v57  ;;  %v1460_v61 = vshrl.u32 %v432_v59, 7  ;;  %vm593_vm1 = vcmask 1041409   ;;  %vm595_vm2 = vcmask 1042434  }
  0x56   :  { %996 = vmatpush3.msra.mxu0 %v152_v1  ;;  %1031 = vmatpush3.msra.mxu1 %v262_v6  ;;  %v147_v8 = vld [vmem:[#allocation11 + $0x50] sm:$0xff]  ;;  %v146_v10 = vld [vmem:[#allocation11 + $0x48] sm:$0xff]  ;;  %v259_v11 = vld [vmem:[#allocation14 + $0x60] sm:$0xff]  ;;  %s1610_s0 = smov (!%p132_p7, %s1597_s0), 3  ;;  %vm597_vm3 = vcmask 1043459   ;;  %vm599_vm4 = vcmask 1044484  }
  0x57   :  { %997 = vmatprep.subr.mxu0 %v1293_v0  ;;  %1032 = vmatprep.subr.mxu1 %v1293_v0  ;;  %v145_v12 = vld [vmem:[#allocation11 + $0x40] sm:$0xff]  ;;  %v258_v13 = vld [vmem:[#allocation14 + $0x58] sm:$0xff]  ;;  %v257_v15 = vld [vmem:[#allocation14 + $0x50] sm:$0xff]  ;;  %s134_s20 = scalar_lea.vmem %s1602_s5, %s1610_s0  ;;  %v431_v60 = vunpack.c.0.s8 %v430_v58  ;;  %vm601_vm5 = vcmask 1045509   ;;  %vm603_vm6 = vcmask 1046534   ;;  %vm605_vm7 = vcmask 1047559  }
  0x58   :  { %998 = vmatpush3.msra.mxu0 %v151_v2  ;;  %1033 = vmatpush3.msra.mxu1 %v261_v7  ;;  %v144_v14 = vld [vmem:[#allocation11 + $0x38] sm:$0xff]  ;;  %v143_v16 = vld [vmem:[#allocation11 + $0x30] sm:$0xff]  ;;  %v256_v17 = vld [vmem:[#allocation14 + $0x48] sm:$0xff]  ;;  %vm608_vm8 = vcmask 64512  }
  0x59   :  { %999 = vmatprep.subr.mxu0 %v1293_v0  ;;  %1034 = vmatprep.subr.mxu1 %v1293_v0  ;;  %v142_v18 = vld [vmem:[#allocation11 + $0x28] sm:$0xff]  ;;  %v255_v19 = vld [vmem:[#allocation14 + $0x40] sm:$0xff]  ;;  %v254_v21 = vld [vmem:[#allocation14 + $0x38] sm:$0xff] }
  0x5a   :  { %1000 = vmatpush3.msra.mxu0 %v150_v3  ;;  %1035 = vmatpush3.msra.mxu1 %v260_v9  ;;  %v141_v20 = vld [vmem:[#allocation11 + $0x20] sm:$0xff]  ;;  %v140_v22 = vld [vmem:[#allocation11 + $0x18] sm:$0xff]  ;;  %v253_v23 = vld [vmem:[#allocation14 + $0x30] sm:$0xff] }
  0x5b   :  { %1001 = vmatprep.subr.mxu0 %v1293_v0  ;;  %1036 = vmatprep.subr.mxu1 %v1293_v0  ;;  %v139_v24 = vld [vmem:[#allocation11 + $0x10] sm:$0xff]  ;;  %v252_v25 = vld [vmem:[#allocation14 + $0x28] sm:$0xff]  ;;  %v251_v27 = vld [vmem:[#allocation14 + $0x20] sm:$0xff] }
  0x5c   :  { %1002 = vmatpush3.msra.mxu0 %v149_v4  ;;  %1037 = vmatpush3.msra.mxu1 %v259_v11  ;;  %v138_v26 = vld [vmem:[#allocation11 + $0x8] sm:$0xff]  ;;  %v137_v28 = vld [vmem:[#allocation11] sm:$0xff]  ;;  %v250_v29 = vld [vmem:[#allocation14 + $0x18] sm:$0xff]  ;;  %v434_v4 = vsub.s32 %v431_v60, %v1460_v61 }
  0x5d   :  { %1003 = vmatprep.subr.mxu0 %v1293_v0  ;;  %1038 = vmatprep.subr.mxu1 %v1293_v0  ;;  %v136_v30 = vld [vmem:[#allocation5] sm:$0xff]  ;;  %v246_v31 = vld [vmem:[#allocation13 + $0x78] sm:$0xff]  ;;  %v244_v34 = vld [vmem:[#allocation13 + $0x68] sm:$0xff] }
  0x5e   :  { %1004 = vmatpush3.msra.mxu0 %v148_v5  ;;  %1039 = vmatpush3.msra.mxu1 %v258_v13  ;;  %v249_v32 = vld [vmem:[#allocation14 + $0x10] sm:$0xff]  ;;  %v243_v35 = vld [vmem:[#allocation13 + $0x60] sm:$0xff]  ;;  %v242_v36 = vld [vmem:[#allocation13 + $0x58] sm:$0xff] }
  0x5f   :  { %1005 = vmatprep.subr.mxu0 %v1293_v0  ;;  %1040 = vmatprep.subr.mxu1 %v1293_v0  ;;  %v245_v33 = vld [vmem:[#allocation13 + $0x70] sm:$0xff]  ;;  %v240_v38 = vld [vmem:[#allocation13 + $0x48] sm:$0xff]  ;;  %v239_v39 = vld [vmem:[#allocation13 + $0x40] sm:$0xff] }
  0x60   :  { %1006 = vmatpush3.msra.mxu0 %v147_v8  ;;  %1041 = vmatpush3.msra.mxu1 %v257_v15  ;;  %v241_v37 = vld [vmem:[#allocation13 + $0x50] sm:$0xff]  ;;  %v238_v40 = vld [vmem:[#allocation13 + $0x38] sm:$0xff]  ;;  %v236_v42 = vld [vmem:[#allocation13 + $0x28] sm:$0xff]  ;;  %v1470_v8 = vsub.s32 0, %v1460_v61 }
  0x61   :  { %1007 = vmatprep.subr.mxu0 %v1293_v0  ;;  %1042 = vmatprep.subr.mxu1 %v1293_v0  ;;  %v237_v41 = vld [vmem:[#allocation13 + $0x30] sm:$0xff]  ;;  %v235_v43 = vld [vmem:[#allocation13 + $0x20] sm:$0xff]  ;;  %v234_v44 = vld [vmem:[#allocation13 + $0x18] sm:$0xff] }
  0x62   :  { %1008 = vmatpush3.msra.mxu0 %v146_v10  ;;  %1043 = vmatpush3.msra.mxu1 %v256_v17  ;;  %v233_v45 = vld [vmem:[#allocation13 + $0x10] sm:$0xff]  ;;  %v232_v46 = vld [vmem:[#allocation13 + $0x8] sm:$0xff]  ;;  %v231_v48 = vld [vmem:[#allocation13] sm:$0xff] }
  0x63   :  { %1009 = vmatprep.subr.mxu0 %v1293_v0  ;;  %1044 = vmatprep.subr.mxu1 %v1293_v0  ;;  %v248_v47 = vld [vmem:[#allocation14 + $0x8] sm:$0xff]  ;;  %v230_v49 = vld [vmem:[#allocation8] sm:$0xff]  ;;  %v247_v50 = vld [vmem:[#allocation14] sm:$0xff] }
  0x64   :  { %1010 = vmatpush3.msra.mxu0 %v145_v12  ;;  %1045 = vmatpush3.msra.mxu1 %v255_v19  ;;  %v940_v51 = vld [vmem:[%s134_s20] ss:$0 sm:$0xff]  ;;  %v1472_v12 = vld [vmem:[#allocation10] sm:$0xff] }
  0x65   :  { %1011 = vmatprep.subr.mxu0 %v1293_v0  ;;  %1046 = vmatprep.subr.mxu1 %v1293_v0  ;;  %v941_v63 = vld [vmem:[%s1605_s8] ss:$0 sm:$0xff] }
  0x66   :  { %1012 = vmatpush3.msra.mxu0 %v144_v14  ;;  %1047 = vmatpush3.msra.mxu1 %v254_v21  ;;  %v942_v1 = vld [vmem:[%s1606_s9] ss:$0 sm:$0xff] }
  0x67   :  { %1013 = vmatprep.subr.mxu0 %v1293_v0  ;;  %1048 = vmatprep.subr.mxu1 %v1293_v0 }
  0x68   :  { %1014 = vmatpush3.msra.mxu0 %v143_v16  ;;  %1049 = vmatpush3.msra.mxu1 %v253_v23  ;;  %v1475_v16 = vld [vmem:[#allocation10 + $0x10] sm:$0xff]  ;;  %v1480_v23 = vld [vmem:[#allocation10 + $0x8] sm:$0xff] }
  0x69   :  { %1015 = vmatprep.subr.mxu0 %v1293_v0  ;;  %1050 = vmatprep.subr.mxu1 %v1293_v0 }
  0x6a   :  { %1016 = vmatpush3.msra.mxu0 %v142_v18  ;;  %1051 = vmatpush3.msra.mxu1 %v252_v25 }
  0x6b   :  { %1017 = vmatprep.subr.mxu0 %v1293_v0  ;;  %1052 = vmatprep.subr.mxu1 %v1293_v0 }
  0x6c   :  { %1018 = vmatpush3.msra.mxu0 %v141_v20  ;;  %1053 = vmatpush3.msra.mxu1 %v251_v27  ;;  %v1484_v27 = vld [vmem:[#allocation10 + $0x18] sm:$0xff] }
  0x6d   :  { %1019 = vmatprep.subr.mxu0 %v1293_v0  ;;  %1054 = vmatprep.subr.mxu1 %v1293_v0 }
  0x6e   :  { %1020 = vmatpush3.msra.mxu0 %v140_v22  ;;  %1055 = vmatpush3.msra.mxu1 %v250_v29 }
  0x6f   :  { %1021 = vmatprep.subr.mxu0 %v1293_v0  ;;  %1056 = vmatprep.subr.mxu1 %v1293_v0 }
  0x70   :  { %1022 = vmatpush3.msra.mxu0 %v139_v24  ;;  %1057 = vmatpush3.msra.mxu1 %v249_v32 }
  0x71   :  { %1023 = vmatprep.subr.mxu0 %v1293_v0  ;;  %1058 = vmatprep.subr.mxu1 %v1293_v0 }
  0x72   :  { %1024 = vmatpush3.msra.mxu0 %v138_v26  ;;  %1059 = vmatpush3.msra.mxu1 %v248_v47 }
  0x73   :  { %1025 = vmatprep.subr.mxu0 %v1293_v0  ;;  %1060 = vmatprep.subr.mxu1 %v1293_v0 }
  0x74   :  { %1026 = vmatpush3.msra.mxu0 %v137_v28  ;;  %1061 = vmatpush3.msra.mxu1 %v247_v50 }
  0x75   :  { %1028 = vmatmul.mubr.f32.vlgmr.msra.gmra.mxu0 %v136_v30  ;;  %1065 = vmatprep.subr.mxu0 %v1293_v0 }
  0x76   :  { %1066 = vmatpush3.msra.mxu0 %v246_v31  ;;  %1097 = vmatprep.mubr.msk.f32.mxu0 %vm1294_vm0, %v1293_v0  ;;  %v1488_v31 = vld [vmem:[#allocation10 + $0x20] sm:$0xff] }
  0x77   :  { %1067 = vmatprep.subr.mxu0 %v1293_v0 }
  0x78   :  { %1068 = vmatpush3.msra.mxu0 %v245_v33 }
  0x79   :  { %1069 = vmatprep.subr.mxu0 %v1293_v0 }
  0x7a   :  { %1070 = vmatpush3.msra.mxu0 %v244_v34 }
  0x7b   :  { %1071 = vmatprep.subr.mxu0 %v1293_v0 }
  0x7c   :  { %1072 = vmatpush3.msra.mxu0 %v243_v35  ;;  %v1492_v35 = vld [vmem:[#allocation10 + $0x28] sm:$0xff] }
  0x7d   :  { %1073 = vmatprep.subr.mxu0 %v1293_v0 }
  0x7e   :  { %1074 = vmatpush3.msra.mxu0 %v242_v36 }
  0x7f   :  { %1075 = vmatprep.subr.mxu0 %v1293_v0 }
  0x80   :  { %1076 = vmatpush3.msra.mxu0 %v241_v37 }
  0x81   :  { %1077 = vmatprep.subr.mxu0 %v1293_v0 }
  0x82   :  { %1078 = vmatpush3.msra.mxu0 %v240_v38  ;;  %v1496_v38 = vld [vmem:[#allocation10 + $0x30] sm:$0xff] }
  0x83   :  { %1079 = vmatprep.subr.mxu0 %v1293_v0 }
  0x84   :  { %1080 = vmatpush3.msra.mxu0 %v239_v39 }
  0x85   :  { %1081 = vmatprep.subr.mxu0 %v1293_v0 }
  0x86   :  { %1082 = vmatpush3.msra.mxu0 %v238_v40 }
  0x87   :  { %1083 = vmatprep.subr.mxu0 %v1293_v0 }
  0x88   :  { %1084 = vmatpush3.msra.mxu0 %v237_v41  ;;  %v1500_v41 = vld [vmem:[#allocation10 + $0x38] sm:$0xff] }
  0x89   :  { %1085 = vmatprep.subr.mxu0 %v1293_v0 }
  0x8a   :  { %1086 = vmatpush3.msra.mxu0 %v236_v42 }
  0x8b   :  { %1087 = vmatprep.subr.mxu0 %v1293_v0 }
  0x8c   :  { %1088 = vmatpush3.msra.mxu0 %v235_v43 }
  0x8d   :  { %1089 = vmatprep.subr.mxu0 %v1293_v0 }
  0x8e   :  { %1090 = vmatpush3.msra.mxu0 %v234_v44  ;;  %v560_v44 = vand.u32 127, %v432_v59 }
  0x8f   :  { %1091 = vmatprep.subr.mxu0 %v1293_v0 }
  0x90   :  { %1092 = vmatpush3.msra.mxu0 %v233_v45  ;;  %v542_v45 = vstv %s1607_s10  ;;  %s1297_s10 = smov [#allocation16]  }
  0x91   :  { %1093 = vmatprep.subr.mxu0 %v1293_v0  ;;  %s921_s22 = sshll.u32 %s1297_s10, 4  ;;  %s922_s22 = int_to_ptr.vmem [resolvable:$true] %s921_s22 }
  0x92   :  { %1094 = vmatpush3.msra.mxu0 %v232_v46  ;;  %s1255_s23 = scalar_lea.vmem %s922_s22, 128  ;;  %p1260_p9 = scmp.lt.s32.totalorder %s922_s22, %s922_s22 }
  0x93   :  { %1095 = vmatprep.subr.mxu0 %v1293_v0  ;;  %p1256_p8 = scmp.ne.s32.totalorder %s922_s22, %s1255_s23  ;;  %p1261_p10 = scmp.lt.s32.totalorder %s1255_s23, %s1255_s23 }
  0x94   :  { %1096 = vmatpush3.msra.mxu0 %v231_v48  ;;  %v1508_v48 = vsub.s32 %v560_v44, %v1460_v61  ;;  %v639_v44 = vsub.s32 6, %v1460_v61 }
  0x95   :  { %1098 = vmatmul.mubr.f32.vlgmr.msra.gmra.mxu0 %v230_v49  ;;  %p1262_p11 = por %p1261_p10, %p1260_p9 }
  0x97   :  { %p1263_p12 = pnand %p1262_p11, %p1256_p8 }
 0x135   :  { %v226_v52 = vpop.f32.mrf.mxu0 }
 0x136   :  { %v227_v53 = vadd.f32 %v940_v51, %v226_v52 }
 0x137   :  { %v1029_v54 = vpop.f32.mrf.mxu0 }
 0x138   :  { %1063 = vmatmul.mubr.f32.vlgmr.msra.gmra.mxu1 %v227_v53 }
 0x155   :  { %v399_v55 = vpop.f32.mrf.mxu0 }
 0x157   :  { %v1099_v56 = vpop.f32.mrf.mxu0 }
 0x1f8   :  { %v329_v62 = vpop.f32.mrf.mxu1 }
 0x1f9   :  { %v400_v0 = vadd.f32 %v399_v55, %v329_v62 }
 0x1fa   :  { %v1064_v2 = vpop.f32.mrf.mxu1 }
 0x1fb   :  { %v410_v3 = vadd.f32 %v941_v63, %v400_v0 }
 0x1fd   :  { %v426_v5 = vmul.f32 %v942_v1, %v410_v3 }
 0x1ff   :  { %v428_v6 = vcombine.high %v426_v5, %v426_v5  ;;  %v435_v7 = vrot.slane %v426_v5, %v434_v4 }
 0x201   :  { %v451_v9 = vrot.slane %v435_v7, %v434_v4  ;;  %v443_v10 = vcombine.high %v435_v7, %v435_v7  ;;  %v442_v11 = vrot.slane %v428_v6, %v434_v4 }
 0x203   :  { %v480_v13 = vrot.slane %v451_v9, %v1470_v8  ;;  %v473_v14 = vcombine.high %v451_v9, %v451_v9  ;;  %v465_v15 = vrot.slane %v443_v10, %v434_v4  ;;  %v458_v17 = vrot.slane %v442_v11, %v434_v4 }
 0x204   :  { %v444_v18 = vcombine.high %v442_v11, %v442_v11 }
 0x205   :  { %v517_v19 = vmul.f32 %v480_v13, %v1472_v12  ;;  %v488_v20 = vrot.slane %v473_v14, %v1470_v8  ;;  %v484_v21 = vrot.slane %v465_v15, %v1470_v8  ;;  %v475_v22 = vcombine.high %v465_v15, %v465_v15 }
 0x206   :  { %v472_v26 = vrot.slane %v444_v18, %v434_v4  ;;  %v496_v29 = vrot.slane %v458_v17, %v1470_v8  ;;  %v474_v30 = vcombine.high %v458_v17, %v458_v17 }
 0x207   :  { %525 = vadd.xlane.f32.xlu0 %v517_v19  ;;  %v519_v24 = vmul.f32 %v488_v20, %v1475_v16  ;;  %v492_v25 = vrot.slane %v475_v22, %v1470_v8  ;;  %v518_v28 = vmul.f32 %v484_v21, %v1480_v23  ;;  %v1296_v19 = vmov 0  }
 0x208   :  { %v500_v33 = vrot.slane %v472_v26, %v1470_v8  ;;  %v476_v34 = vcombine.high %v472_v26, %v472_v26  ;;  %v521_v36 = vmul.f32 %v496_v29, %v1488_v31  ;;  %v504_v37 = vrot.slane %v474_v30, %v1470_v8  ;;  %1114 = vset.pattern.permute.xlu0 %v1296_v19 }
 0x209   :  { %529 = vadd.xlane.f32.xlu1 %v519_v24  ;;  %v520_v32 = vmul.f32 %v492_v25, %v1484_v27  ;;  %v619_v20 = vsub.s32 1, %v1460_v61  ;;  %v623_v21 = vsub.s32 2, %v1460_v61  ;;  %v627_v22 = vsub.s32 3, %v1460_v61 }
 0x20a   :  { %v522_v39 = vmul.f32 %v500_v33, %v1492_v35  ;;  %v508_v40 = vrot.slane %v476_v34, %v1470_v8  ;;  %v523_v42 = vmul.f32 %v504_v37, %v1496_v38  ;;  %1113 = vset.pattern.permute.xlu1 %v1296_v19  ;;  %v631_v29 = vsub.s32 4, %v1460_v61 }
 0x20b   :  { %527 = vadd.xlane.f32.xlu0 %v518_v28 }
 0x20c   :  { %v524_v43 = vmul.f32 %v508_v40, %v1500_v41 }
 0x20d   :  { %531 = vadd.xlane.f32.xlu1 %v520_v32 }
 0x20f   :  { %533 = vadd.xlane.f32.xlu0 %v521_v36 }
 0x211   :  { %535 = vadd.xlane.f32.xlu1 %v522_v39  ;;  %v635_v39 = vsub.s32 5, %v1460_v61 }
 0x213   :  { %537 = vadd.xlane.f32.xlu0 %v523_v42 }
 0x215   :  { %539 = vadd.xlane.f32.xlu1 %v524_v43 }
 0x290   :  { %v526_v46 = vpop.xlane.xlu0 %525 }
 0x291   :  { %v543_v49 = vadd.f32 %v542_v45, %v526_v46 }
 0x292   :  { %v530_v47 = vpop.xlane.xlu1 %529 }
 0x293   :  { %v545_v50 = vadd.f32 %v542_v45, %v530_v47  ;;  %v564_v54 = vrot.slane %v543_v49, %v1508_v48 }
 0x294   :  { %v528_v51 = vpop.xlane.xlu0 %527 }
 0x295   :  { %v544_v52 = vadd.f32 %v542_v45, %v528_v51  ;;  %v572_v57 = vrot.slane %v545_v50, %v1508_v48 }
 0x296   :  { %v532_v53 = vpop.xlane.xlu1 %531 }
 0x297   :  { %v568_v55 = vrot.slane %v544_v52, %v1508_v48  ;;  %v546_v56 = vadd.f32 %v542_v45, %v532_v53 }
 0x298   :  { %v534_v58 = vpop.xlane.xlu0 %533 }
 0x299   :  { %v594_v59 = vsel %vm593_vm1, %v568_v55, %v564_v54  ;;  %v576_v60 = vrot.slane %v546_v56, %v1508_v48  ;;  %v547_v62 = vadd.f32 %v542_v45, %v534_v58 }
 0x29a   :  { %v596_v63 = vsel %vm595_vm2, %v572_v57, %v594_v59  ;;  %v536_v0 = vpop.xlane.xlu1 %535 }
 0x29b   :  { %v598_v1 = vsel %vm597_vm3, %v576_v60, %v596_v63  ;;  %v580_v2 = vrot.slane %v547_v62, %v1508_v48  ;;  %v548_v3 = vadd.f32 %v542_v45, %v536_v0 }
 0x29c   :  { %v538_v4 = vpop.xlane.xlu0 %537 }
 0x29d   :  { %v600_v5 = vsel %vm599_vm4, %v580_v2, %v598_v1  ;;  %v584_v6 = vrot.slane %v548_v3, %v1508_v48  ;;  %v549_v7 = vadd.f32 %v542_v45, %v538_v4 }
 0x29e   :  { %v540_v9 = vpop.xlane.xlu1 %539 }
 0x29f   :  { %v588_v10 = vrot.slane %v549_v7, %v1508_v48  ;;  %v550_v11 = vadd.f32 %v542_v45, %v540_v9  ;;  %v602_v13 = vsel %vm601_vm5, %v584_v6, %v600_v5 }
 0x2a1   :  { %v592_v14 = vrot.slane %v550_v11, %v1508_v48  ;;  %v604_v15 = vsel %vm603_vm6, %v588_v10, %v602_v13 }
 0x2a3   :  { %v606_v17 = vsel %vm605_vm7, %v592_v14, %v604_v15 }
 0x2a4   :  { %v609_v18 = vsel %vm608_vm8, %v606_v17, -inf }
 0x2a5   :  { %610 = vmax.xlane.f32.xlu0 %v609_v18 }
 0x32e   :  { %v611_v24 = vpop.xlane.xlu0 %610 }
 0x32f   :  { %v616_v25 = vrot.slane %v611_v24, %v1470_v8  ;;  %v620_v26 = vrot.slane %v611_v24, %v619_v20  ;;  %v624_v28 = vrot.slane %v611_v24, %v623_v21  ;;  %v628_v30 = vrot.slane %v611_v24, %v627_v22 }
 0x330   :  { %v632_v40 = vrot.slane %v611_v24, %v631_v29  ;;  %v636_v45 = vrot.slane %v611_v24, %v635_v39 }
 0x331   :  { %v653_v32 = vsub.f32 %v543_v49, %v616_v25  ;;  %v654_v33 = vsub.f32 %v544_v52, %v620_v26  ;;  %v655_v34 = vsub.f32 %v545_v50, %v624_v28  ;;  %v656_v42 = vsub.f32 %v546_v56, %v628_v30 }
 0x332   :  { %v657_v46 = vsub.f32 %v547_v62, %v632_v40  ;;  %v643_v49 = vsub.s32 7, %v1460_v61  ;;  %v640_v50 = vrot.slane %v611_v24, %v639_v44  ;;  %v658_v51 = vsub.f32 %v548_v3, %v636_v45 }
 0x333   :  { %v661_v36 = vmul.f32 1.442695, %v653_v32  ;;  %v663_v37 = vmul.f32 1.442695, %v654_v33  ;;  %v665_v43 = vmul.f32 1.442695, %v655_v34 }
 0x334   :  { %v667_v47 = vmul.f32 1.442695, %v656_v42  ;;  %v669_v52 = vmul.f32 1.442695, %v657_v46  ;;  %v644_v53 = vrot.slane %v611_v24, %v643_v49  ;;  %v659_v54 = vsub.f32 %v549_v7, %v640_v50 }
 0x335   :  { %1115 = vpow2.f32 %v661_v36  ;;  %v671_v55 = vmul.f32 1.442695, %v658_v51 }
 0x336   :  { %1117 = vpow2.f32 %v663_v37  ;;  %v660_v58 = vsub.f32 %v550_v11, %v644_v53  ;;  %v673_v59 = vmul.f32 1.442695, %v659_v54 }
 0x337   :  { %1119 = vpow2.f32 %v665_v43 }
 0x338   :  { %1121 = vpow2.f32 %v667_v47  ;;  %v675_v62 = vmul.f32 1.442695, %v660_v58 }
 0x339   :  { %1123 = vpow2.f32 %v669_v52 }
 0x33a   :  { %1125 = vpow2.f32 %v671_v55 }
 0x33b   :  { %1127 = vpow2.f32 %v673_v59 }
 0x33c   :  { %1129 = vpow2.f32 %v675_v62 }
 0x342   :  { %v1116_v56 = vpop.eup %1115 }
 0x343   :  { %v1118_v57 = vpop.eup %1117  ;;  %686 = vperm.xlu1 %1113, %v1116_v56  }
 0x344   :  { %689 = vperm.xlu0 %1114, %v1118_v57   ;;  %v1120_v60 = vpop.eup %1119 }
 0x345   :  { %v1122_v63 = vpop.eup %1121 }
 0x346   :  { %v1124_v0 = vpop.eup %1123 }
 0x347   :  { %692 = vperm.xlu1 %1113, %v1120_v60   ;;  %v1126_v1 = vpop.eup %1125 }
 0x348   :  { %v1128_v2 = vpop.eup %1127 }
 0x349   :  { %v1130_v3 = vpop.eup %1129 }
 0x34b   :  { %695 = vperm.xlu1 %1113, %v1122_v63  }
 0x34f   :  { %698 = vperm.xlu1 %1113, %v1124_v0  }
 0x353   :  { %701 = vperm.xlu1 %1113, %v1126_v1  }
 0x357   :  { %704 = vperm.xlu1 %1113, %v1128_v2  }
 0x35b   :  { %707 = vperm.xlu1 %1113, %v1130_v3  }
 0x3be   :  { %v687_v4 = vpop.permute.xlu1 %686 }
 0x3bf   :  { %v690_v9 = vpop.permute.xlu0 %689  ;;  %v712_v13 = vrot.slane %v687_v4, %v1508_v48 }
 0x3c0   :  { %v716_v11 = vrot.slane %v690_v9, %v1508_v48 }
 0x3c2   :  { %v693_v5 = vpop.permute.xlu1 %692  ;;  %v741_v19 = vsel %vm593_vm1, %v716_v11, %v712_v13 }
 0x3c3   :  { %v720_v14 = vrot.slane %v693_v5, %v1508_v48 }
 0x3c5   :  { %v742_v25 = vsel %vm595_vm2, %v720_v14, %v741_v19 }
 0x3c6   :  { %v696_v6 = vpop.permute.xlu1 %695 }
 0x3c7   :  { %v724_v15 = vrot.slane %v696_v6, %v1508_v48 }
 0x3c9   :  { %v743_v28 = vsel %vm597_vm3, %v724_v15, %v742_v25 }
 0x3ca   :  { %v699_v7 = vpop.permute.xlu1 %698 }
 0x3cb   :  { %v728_v17 = vrot.slane %v699_v7, %v1508_v48 }
 0x3cd   :  { %v744_v30 = vsel %vm599_vm4, %v728_v17, %v743_v28 }
 0x3ce   :  { %v702_v10 = vpop.permute.xlu1 %701 }
 0x3cf   :  { %v732_v24 = vrot.slane %v702_v10, %v1508_v48 }
 0x3d1   :  { %v745_v33 = vsel %vm601_vm5, %v732_v24, %v744_v30 }
 0x3d2   :  { %v705_v18 = vpop.permute.xlu1 %704 }
 0x3d3   :  { %v736_v26 = vrot.slane %v705_v18, %v1508_v48 }
 0x3d5   :  { %v746_v36 = vsel %vm603_vm6, %v736_v26, %v745_v33 }
 0x3d6   :  { %v708_v32 = vpop.permute.xlu1 %707 }
 0x3d7   :  { %v740_v34 = vrot.slane %v708_v32, %v1508_v48 }
 0x3d9   :  { %v747_v37 = vsel %vm605_vm7, %v740_v34, %v746_v36 }
 0x3da   :  { %v749_v40 = vsel %vm608_vm8, %v747_v37, 0.0 }
 0x3db   :  { %750 = vadd.xlane.f32.xlu1 %v749_v40 }
 0x464   :  { %v751_v42 = vpop.xlane.xlu1 %750 }
 0x465   :  { %1131 = vrcp.f32 %v751_v42 }
 0x472   :  { %v1132_v43 = vpop.eup %1131 }
 0x473   :  { %v757_v45 = vrot.slane %v1132_v43, %v1470_v8  ;;  %v761_v47 = vrot.slane %v1132_v43, %v619_v20  ;;  %v765_v48 = vrot.slane %v1132_v43, %v623_v21  ;;  %v769_v52 = vrot.slane %v1132_v43, %v627_v22 }
 0x474   :  { %v773_v54 = vrot.slane %v1132_v43, %v631_v29  ;;  %v777_v20 = vrot.slane %v1132_v43, %v635_v39  ;;  %v781_v21 = vrot.slane %v1132_v43, %v639_v44  ;;  %v785_v22 = vrot.slane %v1132_v43, %v643_v49 }
 0x475   :  { %v794_v46 = vmul.f32 %v1116_v56, %v757_v45  ;;  %v795_v50 = vmul.f32 %v1118_v57, %v761_v47  ;;  %v796_v51 = vmul.f32 %v1120_v60, %v765_v48  ;;  %v797_v53 = vmul.f32 %v1122_v63, %v769_v52 }
 0x476   :  { %v798_v8 = vmul.f32 %v1124_v0, %v773_v54  ;;  %v799_v55 = vmul.f32 %v1126_v1, %v777_v20  ;;  %v800_v56 = vmul.f32 %v1128_v2, %v781_v21  ;;  %v801_v57 = vmul.f32 %v1130_v3, %v785_v22 }
 0x477   :  { %804 = vperm.xlu0 %1114, %v794_v46  }
 0x47b   :  { %809 = vperm.xlu0 %1114, %v795_v50  }
 0x47f   :  { %814 = vperm.xlu0 %1114, %v796_v51  }
 0x483   :  { %819 = vperm.xlu0 %1114, %v797_v53  }
 0x487   :  { %824 = vperm.xlu0 %1114, %v798_v8  }
 0x48b   :  { %829 = vperm.xlu0 %1114, %v799_v55  }
 0x48f   :  { %834 = vperm.xlu0 %1114, %v800_v56  }
 0x493   :  { %839 = vperm.xlu0 %1114, %v801_v57  }
 0x4f2   :  { %v805_v58 = vpop.permute.xlu0 %804 }
 0x4f3   :  { %v842_v62 = vmul.f32 %v805_v58, %v1472_v12 }
 0x4f5   :  { %v850_v2 = vrot.slane %v842_v62, 4 }
 0x4f6   :  { %v810_v29 = vpop.permute.xlu0 %809 }
 0x4f7   :  { %v843_v60 = vmul.f32 %v810_v29, %v1480_v23  ;;  %v851_v6 = vadd.f32 %v850_v2, %v842_v62 }
 0x4f9   :  { %v856_v0 = vrot.slane %v843_v60, 4  ;;  %v852_v13 = vrot.slane %v851_v6, 2 }
 0x4fa   :  { %v815_v59 = vpop.permute.xlu0 %814 }
 0x4fb   :  { %v844_v39 = vmul.f32 %v815_v59, %v1475_v16  ;;  %v857_v4 = vadd.f32 %v856_v0, %v843_v60  ;;  %v853_v25 = vadd.f32 %v852_v13, %v851_v6 }
 0x4fd   :  { %v862_v1 = vrot.slane %v844_v39, 4  ;;  %v858_v10 = vrot.slane %v857_v4, 2  ;;  %v854_v42 = vrot.slane %v853_v25, 1 }
 0x4fe   :  { %v820_v63 = vpop.permute.xlu0 %819 }
 0x4ff   :  { %v845_v44 = vmul.f32 %v820_v63, %v1484_v27  ;;  %v863_v5 = vadd.f32 %v862_v1, %v844_v39  ;;  %v859_v18 = vadd.f32 %v858_v10, %v857_v4  ;;  %v855_v53 = vadd.f32 %v854_v42, %v853_v25 }
 0x501   :  { %v868_v61 = vrot.slane %v845_v44, 4  ;;  %v864_v11 = vrot.slane %v863_v5, 2  ;;  %v860_v34 = vrot.slane %v859_v18, 1 }
 0x502   :  { %v825_v49 = vpop.permute.xlu0 %824 }
 0x503   :  { %v846_v3 = vmul.f32 %v825_v49, %v1488_v31  ;;  %v869_v7 = vadd.f32 %v868_v61, %v845_v44  ;;  %v865_v31 = vadd.f32 %v864_v11, %v863_v5  ;;  %v861_v50 = vadd.f32 %v860_v34, %v859_v18 }
 0x505   :  { %v874_v9 = vrot.slane %v846_v3, 4  ;;  %v870_v14 = vrot.slane %v869_v7, 2  ;;  %v866_v40 = vrot.slane %v865_v31, 1  ;;  %v906_v21 = vsel %vm593_vm1, %v861_v50, %v855_v53 }
 0x506   :  { %v830_v23 = vpop.permute.xlu0 %829 }
 0x507   :  { %v875_v16 = vadd.f32 %v874_v9, %v846_v3  ;;  %v847_v12 = vmul.f32 %v830_v23, %v1492_v35  ;;  %v871_v26 = vadd.f32 %v870_v14, %v869_v7  ;;  %v867_v52 = vadd.f32 %v866_v40, %v865_v31 }
 0x509   :  { %v880_v27 = vrot.slane %v847_v12, 4  ;;  %v876_v15 = vrot.slane %v875_v16, 2  ;;  %v872_v43 = vrot.slane %v871_v26, 1  ;;  %v907_v22 = vsel %vm595_vm2, %v867_v52, %v906_v21 }
 0x50a   :  { %v835_v17 = vpop.permute.xlu0 %834 }
 0x50b   :  { %v881_v19 = vadd.f32 %v880_v27, %v847_v12  ;;  %v848_v24 = vmul.f32 %v835_v17, %v1496_v38  ;;  %v877_v32 = vadd.f32 %v876_v15, %v875_v16  ;;  %v873_v54 = vadd.f32 %v872_v43, %v871_v26 }
 0x50d   :  { %v882_v28 = vrot.slane %v881_v19, 2  ;;  %v886_v30 = vrot.slane %v848_v24, 4  ;;  %v878_v47 = vrot.slane %v877_v32, 1  ;;  %v908_v58 = vsel %vm597_vm3, %v873_v54, %v907_v22 }
 0x50e   :  { %v840_v33 = vpop.permute.xlu0 %839 }
 0x50f   :  { %v883_v36 = vadd.f32 %v882_v28, %v881_v19  ;;  %v887_v35 = vadd.f32 %v886_v30, %v848_v24  ;;  %v849_v37 = vmul.f32 %v840_v33, %v1500_v41  ;;  %v879_v55 = vadd.f32 %v878_v47, %v877_v32 }
 0x511   :  { %v888_v45 = vrot.slane %v887_v35, 2  ;;  %v892_v46 = vrot.slane %v849_v37, 4  ;;  %v884_v38 = vrot.slane %v883_v36, 1  ;;  %v909_v59 = vsel %vm599_vm4, %v879_v55, %v908_v58 }
 0x513   :  { %v889_v48 = vadd.f32 %v888_v45, %v887_v35  ;;  %v893_v51 = vadd.f32 %v892_v46, %v849_v37  ;;  %v885_v56 = vadd.f32 %v884_v38, %v883_v36 }
 0x515   :  { %v890_v8 = vrot.slane %v889_v48, 1  ;;  %v894_v20 = vrot.slane %v893_v51, 2  ;;  %v910_v39 = vsel %vm601_vm5, %v885_v56, %v909_v59 }
 0x517   :  { %v895_v41 = vadd.f32 %v894_v20, %v893_v51  ;;  %v891_v57 = vadd.f32 %v890_v8, %v889_v48 }
 0x519   :  { %v896_v29 = vrot.slane %v895_v41, 1  ;;  %v911_v62 = vsel %vm603_vm6, %v891_v57, %v910_v39 }
 0x51b   :  { %v897_v60 = vadd.f32 %v896_v29, %v895_v41 }
 0x51d   :  { %v912_v63 = vsel %vm605_vm7, %v897_v60, %v911_v62 }
 0x51e   :  { %914 = vst [vmem:[#allocation16] sm:$0xff] %v912_v63 }
 0x51f   :  { %1266 = shalt.err (!%p1263_p12)
}
 0x520   :  { %924 = dma.vmem_to_hbm [thread:$0]  %s922_s22, 128, %s1608_s11, [#allocation7]  }
 0x521   :  { %1283 = dma.done.wait [#allocation7], 128  }
 0x522   :  { %1284 = vsyncadd [#allocation7], 4294967168 }
 0x523   :  { %928 = vsyncpa [#allocation6], 1 }
 0x524   :  { %929 = vsyncpa [#allocation9], 1 }
 0x525   :  { %930 = vsyncpa [#allocation12], 1 }
 0x526   :  { %931 = vsyncpa [#allocation15], 1 }
 0x527   :  { %932 = vsyncpa [#allocation7], 1 }

</bundles_post_ra>
